<compile_context>
chip_gen: v6e
topology: v6e:2x2x1
jax: 0.10.0
libtpu: 0.0.40
codegen_flags: <defaults>
</compile_context>

<pallas_src>
import math
import functools

import jax
import jax.numpy as jnp
from jax.experimental import pallas as pl
from jax.experimental.pallas import tpu as pltpu


def _round_up(x, m):
    return (x + m - 1) // m * m


def _choose_block_b(B, bytes_per_row, fixed_bytes, budget=20 << 20):
    """Batch tile: multiple of 8 (or the full batch), >=2 tiles when the batch is
    large (v7x megacore sharding), and small enough that the double-buffered
    working set fits `budget` bytes of VMEM."""
    tb = min(B, 512)
    if tb != B:
        tb = max(8, (tb // 8) * 8)
    if B >= 64:
        tb = min(tb, max(8, (B // 16) * 8))   # >= 2 batch tiles
    if tb != B:
        while tb > 8 and 2 * tb * bytes_per_row + fixed_bytes > budget:
            tb = max(8, (tb // 2 // 8) * 8)
    return tb


# ----------------------------- kernels --------------------------------------


def _decay_matmul_kernel(d_ref, wt_ref, b_ref, o_ref):
    # d_ref : (tb, In)        VMEM
    # wt_ref: (In, tn)        VMEM (W transposed, zero-padded along Out)
    # b_ref : (1, tn)         VMEM
    # o_ref : (tb, tn)        VMEM
    x = jnp.dot(d_ref[...], wt_ref[...], preferred_element_type=jnp.float32)
    x = x + b_ref[...]                          # broadcast bias over the batch tile
    o_ref[...] = jnp.exp(-jnp.maximum(x, 0.0)).astype(o_ref.dtype)


def _decay_diag_kernel(d_ref, w_ref, b_ref, o_ref):
    # Elementwise fast path for diag=True: gamma = exp(-relu(d * diag(W) + b)).
    x = d_ref[...].astype(jnp.float32) * w_ref[...] + b_ref[...]
    o_ref[...] = jnp.exp(-jnp.maximum(x, 0.0)).astype(o_ref.dtype)


# ----------------------------- wrapper ---------------------------------------


def temporal_decay(d, W, b, *, diag=False, block_b=None,
                   matmul_dtype=None, out_dtype=None):
    """gamma = exp(-relu(linear(d, W (diag-masked if requested), b)))

    d : (B, input_size) float32
    W : (output_size, input_size) float32   (PyTorch F.linear convention)
    b : (output_size,) float32
    returns (B, output_size) in `out_dtype` (defaults to d.dtype)
    """
    B, in_size = d.shape
    out_size, in_size_w = W.shape
    assert in_size == in_size_w
    out_dtype = out_dtype if out_dtype is not None else d.dtype

    if diag:
        assert in_size == out_size
        # Only the diagonal of W contributes: pure VPU work, no matmul, no NxN mask.
        w_diag = jnp.diagonal(W).reshape(1, out_size).astype(jnp.float32)
        b2 = b.reshape(1, out_size).astype(jnp.float32)
        tb = block_b or _choose_block_b(
            B, bytes_per_row=4 * (in_size + out_size), fixed_bytes=16 * out_size)
        # Output lane-padding skipped here: the kernel is a handful of VPU ops, so
        # masked stores on a sub-128 Out are not the bottleneck.
        return pl.pallas_call(
            _decay_diag_kernel,
            out_shape=jax.ShapeDtypeStruct((B, out_size), out_dtype),
            grid_spec=pltpu.PrefetchScalarGridSpec(
                num_scalar_prefetch=0,
                grid=(pl.cdiv(B, tb),),
                in_specs=[
                    pl.BlockSpec((tb, in_size), lambda i: (i, 0)),
                    pl.BlockSpec((1, out_size), lambda i: (0, 0)),
                    pl.BlockSpec((1, out_size), lambda i: (0, 0)),
                ],
                out_specs=pl.BlockSpec((tb, out_size), lambda i: (i, 0)),
            ),
            compiler_params=pltpu.CompilerParams(
                dimension_semantics=("parallel",),
                vmem_limit_bytes=32 * 1024 * 1024,
            ),
        )(d, w_diag, b2)

    # ---------------- dense path: MXU matmul tiled over (batch, out) ----------
    out_pad = _round_up(out_size, 128)
    Wt = W.T.astype(jnp.float32)                 # (In, Out) -- glue transpose
    b2 = b.astype(jnp.float32)
    if out_pad != out_size:
        # Zero-pad the output dim so stores are lane-dense (multiple of 128);
        # padded columns compute exp(-relu(0)) = 1 and are sliced off below.
        Wt = jnp.pad(Wt, ((0, 0), (0, out_pad - out_size)))
        b2 = jnp.pad(b2, (0, out_pad - out_size))
    b2 = b2.reshape(1, out_pad)

    if matmul_dtype is not None:                 # e.g. jnp.bfloat16 on v6e/v7x
        d_in = d.astype(matmul_dtype)
        Wt = Wt.astype(matmul_dtype)
    else:
        d_in = d

    # Output tile: multiple of 128 lanes, bounded at 512 so the (In, tn) weight
    # buffers stay small even on v7x's 64 MiB VMEM.
    block_n = 512 if out_pad % 512 == 0 else (256 if out_pad % 256 == 0 else 128)
    block_n = min(block_n, out_pad)

    in_bytes = jnp.dtype(d_in.dtype).itemsize
    out_bytes = jnp.dtype(out_dtype).itemsize
    tb = block_b or _choose_block_b(
        B,
        bytes_per_row=in_bytes * in_size + out_bytes * block_n,
        fixed_bytes=2 * (in_bytes * in_size * block_n + 4 * block_n),
    )
    # TODO(synk): for very large input_size (>~4K) add a trailing "arbitrary"
    # K-reduction grid axis with an f32 VMEM accumulator so weight K-tiles stay
    # bounded; full-In blocks are fine for RITS-style hidden sizes.

    grid = (pl.cdiv(B, tb), out_pad // block_n)

    out = pl.pallas_call(
        _decay_matmul_kernel,
        out_shape=jax.ShapeDtypeStruct((B, out_pad), out_dtype),
        grid_spec=pltpu.PrefetchScalarGridSpec(
            num_scalar_prefetch=0,
            grid=grid,
            in_specs=[
                pl.BlockSpec((tb, in_size), lambda i, j: (i, 0)),
                pl.BlockSpec((in_size, block_n), lambda i, j: (0, j)),
                pl.BlockSpec((1, block_n), lambda i, j: (0, j)),
            ],
            out_specs=pl.BlockSpec((tb, block_n), lambda i, j: (i, j)),
        ),
        compiler_params=pltpu.CompilerParams(
            dimension_semantics=("parallel", "parallel"),
            vmem_limit_bytes=32 * 1024 * 1024,
        ),
    )(d_in, Wt, b2)

    if out_pad != out_size:
        out = out[:, :out_size]
    return out


def _reference(d, W, b, diag):
    if diag:
        W = W * jnp.eye(W.shape[0], dtype=W.dtype)
    return jnp.exp(-jnp.maximum(d @ W.T + b, 0.0))


if __name__ == "__main__":
    key = jax.random.PRNGKey(0)

    # Small shapes consistent with the module's forward (RITS-style delta inputs).
    batch = 8
    input_size = 32
    output_size = 32

    k_d, k_w, k_b = jax.random.split(key, 3)

    # Deterministic init mirroring reset_parameters(): U(-stdv, stdv), stdv = 1/sqrt(output_size)
    stdv = 1.0 / math.sqrt(output_size)
    d = jax.random.uniform(k_d, (batch, input_size), dtype=jnp.float32)          # deltas >= 0
    W = jax.random.uniform(k_w, (output_size, input_size), jnp.float32, -stdv, stdv)
    b = jax.random.uniform(k_b, (output_size,), jnp.float32, -stdv, stdv)

    ok = True
    for diag in (False, True):
        fn = jax.jit(functools.partial(temporal_decay, diag=diag))
        out = jax.block_until_ready(fn(d, W, b))
        ref = _reference(d, W, b, diag)
        if out.shape != ref.shape or not jnp.allclose(out, ref, atol=1e-5, rtol=1e-5):
            ok = False
            print(f"MISMATCH (diag={diag}): max abs err ="
                  f" {float(jnp.max(jnp.abs(out - ref)))}")

    if ok:
        print("KERNEL_OK")
</pallas_src>

<mosaic_0001>
module attributes {stable_mosaic.version = 11 : i64} {
  func.func @_decay_matmul_kernel(%arg0: i32, %arg1: i32, %arg2: memref<8x32xf32, #tpu.memory_space<vmem>>, %arg3: memref<32x128xf32, #tpu.memory_space<vmem>>, %arg4: memref<1x128xf32, #tpu.memory_space<vmem>>, %arg5: memref<8x128xf32, #tpu.memory_space<vmem>>) attributes {dimension_semantics = [#tpu.dimension_semantics<parallel>, #tpu.dimension_semantics<parallel>], iteration_bounds = array<i64: 1, 1>, scalar_prefetch = 0 : i64, scratch_operands = 0 : i64, tpu.core_type = #tpu.core_type<tc>, window_params = [{transform_indices = @transform_0, window_bounds = array<i64: 8, 32>}, {transform_indices = @transform_1, window_bounds = array<i64: 32, 128>}, {transform_indices = @transform_2, window_bounds = array<i64: 1, 128>}, {transform_indices = @transform_3, window_bounds = array<i64: 8, 128>}]} {
    %c0 = arith.constant 0 : index
    %c0_0 = arith.constant 0 : index
    %0 = vector.load %arg2[%c0, %c0_0] : memref<8x32xf32, #tpu.memory_space<vmem>>, vector<8x32xf32>
    %c0_1 = arith.constant 0 : index
    %c0_2 = arith.constant 0 : index
    %1 = vector.load %arg3[%c0_1, %c0_2] : memref<32x128xf32, #tpu.memory_space<vmem>>, vector<32x128xf32>
    %cst = arith.constant dense<0.000000e+00> : vector<8x128xf32>
    %2 = tpu.matmul %0, %1, %cst {dimension_numbers = #tpu.dot_dimension_numbers<[1], [0], [0], [1], [0, 0, 1, 1], [], []>} : vector<8x32xf32>, vector<32x128xf32>, vector<8x128xf32> -> vector<8x128xf32>
    %c0_3 = arith.constant 0 : index
    %c0_4 = arith.constant 0 : index
    %3 = vector.load %arg4[%c0_3, %c0_4] : memref<1x128xf32, #tpu.memory_space<vmem>>, vector<1x128xf32>
    %4 = vector.broadcast %3 : vector<1x128xf32> to vector<8x128xf32>
    %5 = arith.addf %2, %4 : vector<8x128xf32>
    %cst_5 = arith.constant 0.000000e+00 : f32
    %6 = vector.broadcast %cst_5 : f32 to vector<8x128xf32>
    %7 = arith.maximumf %5, %6 : vector<8x128xf32>
    %cst_6 = arith.constant 0.000000e+00 : f32
    %8 = vector.broadcast %cst_6 : f32 to vector<8x128xf32>
    %9 = arith.subf %8, %7 : vector<8x128xf32>
    %10 = math.exp %9 : vector<8x128xf32>
    %c0_7 = arith.constant 0 : index
    %c0_8 = arith.constant 0 : index
    %11 = vector.load %arg5[%c0_7, %c0_8] : memref<8x128xf32, #tpu.memory_space<vmem>>, vector<8x128xf32>
    tpu.vector_store %arg5[%c0_7, %c0_8], %10 {strides = array<i32>} : memref<8x128xf32, #tpu.memory_space<vmem>>, vector<8x128xf32>,
    return
  }
  func.func @transform_0(%arg0: i32, %arg1: i32) -> (i32, i32) {
    %c0_i32 = arith.constant 0 : i32
    %c0_i32_0 = arith.constant 0 : i32
    return %arg0, %c0_i32 : i32, i32
  }
  func.func @transform_1(%arg0: i32, %arg1: i32) -> (i32, i32) {
    %c0_i32 = arith.constant 0 : i32
    %c0_i32_0 = arith.constant 0 : i32
    return %c0_i32, %arg1 : i32, i32
  }
  func.func @transform_2(%arg0: i32, %arg1: i32) -> (i32, i32) {
    %c0_i32 = arith.constant 0 : i32
    %c0_i32_0 = arith.constant 0 : i32
    return %c0_i32, %arg1 : i32, i32
  }
  func.func @transform_3(%arg0: i32, %arg1: i32) -> (i32, i32) {
    %c0_i32 = arith.constant 0 : i32
    return %arg0, %arg1 : i32, i32
  }
}

</mosaic_0001>

<bundles_post_ra>
// kernel: temporal_decay.1
= control target key start
LH: loop header
LB: loop body
LE: loop exit
PB: predicated region body
PF: predicated region fallthrough
CT: control target
= control target key end

     0   :  { %v165_v1 = vmov 0.0   ;;  %vm166_vm0 = vmmov 0   ;;  %s209_s0 = inlined_call_operand.vmem [shape: f32[8,32], index: 0, kind: input, shape index: {}]   ;;  %s210_s1 = inlined_call_operand.vmem [shape: f32[32,128], index: 1, kind: input, shape index: {}]   ;;  %s211_s2 = inlined_call_operand.vmem [shape: f32[1,128], index: 2, kind: input, shape index: {}]   ;;  %s212_s3 = inlined_call_operand.hbm [shape: f32[8,128], index: 3, kind: output, shape index: {}]  }
   0x1   :  { %v19_v0 = vld [vmem:[%s210_s1 + $0x18] sm:$0xff]  ;;  %127 = vmatprep.subr.mxu0 %v165_v1  ;;  %v18_v2 = vld [vmem:[%s210_s1 + $0x10] sm:$0xff]  ;;  %135 = vmatprep.mubr.msk.f32.mxu0 %vm166_vm0, %v165_v1 }
   0x2   :  { %128 = vmatpush3.msra.mxu0 %v19_v0 }
   0x3   :  { %8 = vsyncpa [#allocation3], 0  ;;  %129 = vmatprep.subr.mxu0 %v165_v1  ;;  %v17_v3 = vld [vmem:[%s210_s1 + $0x8] sm:$0xff]  ;;  %v16_v4 = vld [vmem:[%s210_s1] sm:$0xff]  ;;  %vm27_vm1 = vcmask 261120   ;;  %s167_s1 = smov [#allocation2]  }
   0x4   :  { %130 = vmatpush3.msra.mxu0 %v18_v2  ;;  %v15_v5 = vld [vmem:[%s209_s0] sm:$0xff]  ;;  %s112_s24 = sshll.u32 %s167_s1, 4  ;;  %s113_s24 = int_to_ptr.vmem [resolvable:$true] %s112_s24 }
   0x5   :  { %131 = vmatprep.subr.mxu0 %v165_v1  ;;  %v120_v6 = vld [vmem:[%s211_s2] ss:$0 sm:$0xff]  ;;  %s143_s0 = scalar_lea.vmem %s113_s24, 128  ;;  %p148_p1 = scmp.lt.s32.totalorder %s113_s24, %s113_s24 }
   0x6   :  { %132 = vmatpush3.msra.mxu0 %v17_v3  ;;  %p144_p0 = scmp.ne.s32.totalorder %s113_s24, %s143_s0  ;;  %p149_p2 = scmp.lt.s32.totalorder %s143_s0, %s143_s0 }
   0x7   :  { %133 = vmatprep.subr.mxu0 %v165_v1 }
   0x8   :  { %134 = vmatpush3.msra.mxu0 %v16_v4  ;;  %p150_p3 = por %p149_p2, %p148_p1 }
   0x9   :  { %136 = vmatmul.mubr.msk.f32.vlgmr.msra.gmra.mxu0 %vm27_vm1, %v15_v5 }
   0xa   :  { %p151_p4 = pnand %p150_p3, %p144_p0 }
  0xc9   :  { %v97_v7 = vpop.f32.mrf.mxu0 }
  0xca   :  { %v98_v8 = vadd.f32 %v120_v6, %v97_v7 }
  0xcb   :  { %v137_v9 = vpop.f32.mrf.mxu0 }
  0xcc   :  { %v101_v10 = vmax.f32 %v98_v8, 0.0 }
  0xce   :  { %v102_v11 = vsub.f32 0.0, %v101_v10 }
  0xd0   :  { %v103_v12 = vmul.f32 1.442695, %v102_v11 }
  0xd2   :  { %141 = vpow2.f32 %v103_v12 }
  0xdf   :  { %v142_v13 = vpop.eup %141 }
  0xe0   :  { %105 = vst [vmem:[#allocation2] sm:$0xff] %v142_v13 }
  0xe1   :  { %154 = shalt.err (!%p151_p4)
}
  0xe2   :  { %115 = dma.vmem_to_hbm [thread:$0]  %s113_s24, 128, %s212_s3, [#allocation3]  }
  0xe3   :  { %163 = dma.done.wait [#allocation3], 128  }
  0xe4   :  { %164 = vsyncadd [#allocation3], 4294967168 }
  0xe5   :  { %119 = vsyncpa [#allocation3], 1 }

</bundles_post_ra>
